<compile_context>
chip_gen: v6e
topology: v6e:2x2x1
jax: 0.10.0
libtpu: 0.0.40
codegen_flags: <defaults>
</compile_context>

<pallas_src>
import functools

import jax
import jax.numpy as jnp
from jax.experimental import pallas as pl
from jax.experimental.pallas import tpu as pltpu

EPS = 1e-5
DROP_P = 0.2


def _align8(n):
    return (n + 7) // 8 * 8


def _param_layout(input_size, hidden_size, ft_size, num_classes):
    """Row offsets of each parameter inside the packed [rows, width] buffer.

    Every section starts on an 8-row (sublane) boundary so static ref slices in
    the kernel stay sublane-aligned.
    """
    width = max(hidden_size, ft_size, num_classes)
    row_w1 = 0
    row_g1 = _align8(row_w1 + input_size)
    row_be1 = row_g1 + 1
    row_w2 = _align8(row_be1 + 1)
    row_g2 = _align8(row_w2 + hidden_size)
    row_be2 = row_g2 + 1
    row_w3 = _align8(row_be2 + 1)          # stores w3^T (num_classes rows)
    row_b3 = _align8(row_w3 + num_classes)
    rows = _align8(row_b3 + 1)
    return dict(width=width, rows=rows,
                row_w1=row_w1, row_g1=row_g1, row_be1=row_be1,
                row_w2=row_w2, row_g2=row_g2, row_be2=row_be2,
                row_w3=row_w3, row_b3=row_b3)


def pack_params(params, input_size, hidden_size, ft_size, num_classes):
    """Pack all parameters into one f32 buffer -> one input DMA instead of ten.

    linear1/linear2 biases are intentionally dropped (cancelled by BatchNorm's
    mean subtraction in training mode).
    """
    (w1, b1, g1, be1, w2, b2, g2, be2, w3, b3) = params
    del b1, b2  # exactly cancelled by BN mean subtraction
    L = _param_layout(input_size, hidden_size, ft_size, num_classes)
    P = jnp.zeros((L["rows"], L["width"]), jnp.float32)
    P = P.at[L["row_w1"]:L["row_w1"] + input_size, :hidden_size].set(w1)
    P = P.at[L["row_g1"], :hidden_size].set(g1.reshape(-1))
    P = P.at[L["row_be1"], :hidden_size].set(be1.reshape(-1))
    P = P.at[L["row_w2"]:L["row_w2"] + hidden_size, :ft_size].set(w2)
    P = P.at[L["row_g2"], :ft_size].set(g2.reshape(-1))
    P = P.at[L["row_be2"], :ft_size].set(be2.reshape(-1))
    P = P.at[L["row_w3"]:L["row_w3"] + num_classes, :ft_size].set(w3.T)
    P = P.at[L["row_b3"], :num_classes].set(b3.reshape(-1))
    return P


def _perception_kernel(x_ref, p_ref, u_ref, out_ref, *,
                       input_size, hidden_size, ft_size, num_classes,
                       batch, layout):
    L = layout
    inv_keep = 1.0 / (1.0 - DROP_P)
    x = x_ref[...].astype(jnp.float32)

    def bn_relu_drop(h, gamma, beta, u):
        # Training-mode BatchNorm1d (biased batch stats) fused into a single
        # scale/shift FMA on the big tile; dropout's 1/(1-p) scaling is folded
        # into the per-feature scale/shift (ReLU(c*y) == c*ReLU(y) for c > 0).
        mu = jnp.mean(h, axis=0, keepdims=True)
        d = h - mu
        var = jnp.mean(d * d, axis=0, keepdims=True)
        scale = gamma * jax.lax.rsqrt(var + EPS) * inv_keep   # [1, F], free
        shift = beta * inv_keep                               # [1, F], free
        act = jnp.maximum(d * scale + shift, 0.0)
        return jnp.where(u >= DROP_P, act, 0.0)               # keep-prob 1-p

    # ---- block 1: linear1 (bias cancelled by BN) on the VPU (K == input_size
    # is degenerate for the MXU) -> bn1 -> relu -> dropout
    h = x[:, 0:1] * p_ref[L["row_w1"]:L["row_w1"] + 1, 0:hidden_size]
    for k in range(1, input_size):
        h = h + x[:, k:k + 1] * p_ref[L["row_w1"] + k:L["row_w1"] + k + 1,
                                      0:hidden_size]
    h = bn_relu_drop(
        h,
        p_ref[L["row_g1"]:L["row_g1"] + 1, 0:hidden_size],
        p_ref[L["row_be1"]:L["row_be1"] + 1, 0:hidden_size],
        u_ref[0:batch, 0:hidden_size])

    # ---- block 2: linear2 (hidden x ft): the only MXU matmul -> bn2 -> relu -> drop
    w2 = p_ref[L["row_w2"]:L["row_w2"] + hidden_size, 0:ft_size]
    h = jnp.dot(h, w2, preferred_element_type=jnp.float32)
    h = bn_relu_drop(
        h,
        p_ref[L["row_g2"]:L["row_g2"] + 1, 0:ft_size],
        p_ref[L["row_be2"]:L["row_be2"] + 1, 0:ft_size],
        u_ref[batch:2 * batch, 0:ft_size])

    # ---- head: linear3 (N == num_classes is degenerate for the MXU):
    # per-class VPU multiply + XLU lane reduction, stored column by column.
    b3 = p_ref[L["row_b3"]:L["row_b3"] + 1, 0:num_classes]     # [1, C]
    for c in range(num_classes):
        w3c = p_ref[L["row_w3"] + c:L["row_w3"] + c + 1, 0:ft_size]  # row of w3^T
        oc = jnp.sum(h * w3c, axis=1, keepdims=True) + b3[:, c:c + 1]
        out_ref[:, c:c + 1] = oc.astype(out_ref.dtype)
    # NOTE: at batch=8 the narrow (C=2) output store is negligible; for large
    # batch, pad/transpose the output to a lane-dense layout in the wrapper.


def perception_forward(x, packed_params, uniforms, *,
                       input_size, hidden_size, ft_size, num_classes):
    batch = x.shape[0]
    layout = _param_layout(input_size, hidden_size, ft_size, num_classes)

    kernel = functools.partial(
        _perception_kernel,
        input_size=input_size, hidden_size=hidden_size, ft_size=ft_size,
        num_classes=num_classes, batch=batch, layout=layout)

    vmem_spec = pl.BlockSpec(memory_space=pltpu.MemorySpace.VMEM)

    flops = 2 * batch * (input_size * hidden_size
                         + hidden_size * ft_size
                         + ft_size * num_classes)
    bytes_accessed = 4 * (x.size + packed_params.size + uniforms.size
                          + batch * num_classes)

    return pl.pallas_call(
        kernel,
        out_shape=jax.ShapeDtypeStruct((batch, num_classes), jnp.float32),
        # No grid: whole (tiny) arrays live in VMEM, one DMA each, no
        # double-buffering / pipeline prologue.
        in_specs=[vmem_spec, vmem_spec, vmem_spec],
        out_specs=vmem_spec,
        cost_estimate=pl.CostEstimate(
            flops=flops,
            transcendentals=2 * max(hidden_size, ft_size),
            bytes_accessed=bytes_accessed),
    )(x, packed_params, uniforms)


def init_params(key, input_size=2, hidden_size=20, ft_size=20, num_classes=2):
    """nn.Linear default init (uniform +-1/sqrt(fan_in)); BN gamma=1, beta=0.
    Weights stored as [in, out]."""
    ks = jax.random.split(key, 6)

    def linear(kw, kb, fan_in, fan_out):
        bound = 1.0 / jnp.sqrt(float(fan_in))
        w = jax.random.uniform(kw, (fan_in, fan_out), jnp.float32, -bound, bound)
        b = jax.random.uniform(kb, (1, fan_out), jnp.float32, -bound, bound)
        return w, b

    w1, b1 = linear(ks[0], ks[1], input_size, hidden_size)
    w2, b2 = linear(ks[2], ks[3], hidden_size, ft_size)
    w3, b3 = linear(ks[4], ks[5], ft_size, num_classes)

    g1 = jnp.ones((1, hidden_size), jnp.float32)
    be1 = jnp.zeros((1, hidden_size), jnp.float32)
    g2 = jnp.ones((1, ft_size), jnp.float32)
    be2 = jnp.zeros((1, ft_size), jnp.float32)
    return (w1, b1, g1, be1, w2, b2, g2, be2, w3, b3)


def reference_forward(x, params, uniforms):
    """Pure-JAX reference with identical semantics (biases included, BN training
    mode, same dropout uniforms) used to validate the kernel."""
    (w1, b1, g1, be1, w2, b2, g2, be2, w3, b3) = params

    def bn(h, g, be):
        mu = h.mean(axis=0, keepdims=True)
        var = ((h - mu) ** 2).mean(axis=0, keepdims=True)
        return (h - mu) / jnp.sqrt(var + EPS) * g + be

    def drop(h, u):
        return jnp.where(u >= DROP_P, h / (1.0 - DROP_P), 0.0)

    B = x.shape[0]
    h = x @ w1 + b1
    h = drop(jnp.maximum(bn(h, g1, be1), 0.0), uniforms[:B, :w1.shape[1]])
    h = h @ w2 + b2
    h = drop(jnp.maximum(bn(h, g2, be2), 0.0), uniforms[B:, :w2.shape[1]])
    return h @ w3 + b3


if __name__ == "__main__":
    key = jax.random.PRNGKey(0)
    k_x, k_p, k_drop = jax.random.split(key, 3)

    batch = 8
    input_size, hidden_size, ft_size, num_classes = 2, 20, 20, 2

    x = jax.random.normal(k_x, (batch, input_size), jnp.float32)
    params = init_params(k_p, input_size, hidden_size, ft_size, num_classes)

    # Pre-pack parameters once (single DMA at kernel time).
    packed = pack_params(params, input_size, hidden_size, ft_size, num_classes)

    # One uniform draw covering both dropout layers (split inside the kernel).
    width = max(hidden_size, ft_size)
    uniforms = jax.random.uniform(k_drop, (2 * batch, width), jnp.float32)

    fwd = jax.jit(functools.partial(
        perception_forward,
        input_size=input_size, hidden_size=hidden_size,
        ft_size=ft_size, num_classes=num_classes))

    out = jax.block_until_ready(fwd(x, packed, uniforms))

    assert out.shape == (batch, num_classes)
    assert out.dtype == jnp.float32

    ref = reference_forward(x, params, uniforms)
    max_err = float(jnp.max(jnp.abs(out - ref)))
    assert max_err < 1e-4, f"kernel/reference mismatch: {max_err}"

    print("KERNEL_OK")
</pallas_src>

<mosaic_0001>
module attributes {stable_mosaic.version = 11 : i64} {
  func.func @_perception_kernel(%arg0: memref<8x2xf32, #tpu.memory_space<vmem>>, %arg1: memref<64x20xf32, #tpu.memory_space<vmem>>, %arg2: memref<16x20xf32, #tpu.memory_space<vmem>>, %arg3: memref<8x2xf32, #tpu.memory_space<vmem>>) attributes {dimension_semantics = [], scalar_prefetch = 0 : i64, scratch_operands = 0 : i64, tpu.core_type = #tpu.core_type<tc>} {
    %c0 = arith.constant 0 : index
    %c0_0 = arith.constant 0 : index
    %0 = vector.load %arg0[%c0, %c0_0] : memref<8x2xf32, #tpu.memory_space<vmem>>, vector<8x2xf32>
    %1 = vector.extract_strided_slice %0 {offsets = [0, 0], sizes = [8, 1], strides = [1, 1]} : vector<8x2xf32> to vector<8x1xf32>
    %c0_1 = arith.constant 0 : index
    %c0_2 = arith.constant 0 : index
    %2 = vector.load %arg1[%c0_1, %c0_2] : memref<64x20xf32, #tpu.memory_space<vmem>>, vector<1x20xf32>
    %3 = vector.broadcast %1 : vector<8x1xf32> to vector<8x20xf32>
    %4 = vector.broadcast %2 : vector<1x20xf32> to vector<8x20xf32>
    %5 = arith.mulf %3, %4 : vector<8x20xf32>
    %6 = vector.extract_strided_slice %0 {offsets = [0, 1], sizes = [8, 1], strides = [1, 1]} : vector<8x2xf32> to vector<8x1xf32>
    %c1 = arith.constant 1 : index
    %c0_3 = arith.constant 0 : index
    %7 = vector.load %arg1[%c1, %c0_3] : memref<64x20xf32, #tpu.memory_space<vmem>>, vector<1x20xf32>
    %8 = vector.broadcast %6 : vector<8x1xf32> to vector<8x20xf32>
    %9 = vector.broadcast %7 : vector<1x20xf32> to vector<8x20xf32>
    %10 = arith.mulf %8, %9 : vector<8x20xf32>
    %11 = arith.addf %5, %10 : vector<8x20xf32>
    %c8 = arith.constant 8 : index
    %c0_4 = arith.constant 0 : index
    %12 = vector.load %arg1[%c8, %c0_4] : memref<64x20xf32, #tpu.memory_space<vmem>>, vector<1x20xf32>
    %c9 = arith.constant 9 : index
    %c0_5 = arith.constant 0 : index
    %13 = vector.load %arg1[%c9, %c0_5] : memref<64x20xf32, #tpu.memory_space<vmem>>, vector<1x20xf32>
    %c0_6 = arith.constant 0 : index
    %c0_7 = arith.constant 0 : index
    %14 = vector.load %arg2[%c0_6, %c0_7] : memref<16x20xf32, #tpu.memory_space<vmem>>, vector<8x20xf32>
    %cst = arith.constant dense<0.000000e+00> : vector<20xf32>
    %15 = vector.multi_reduction <add>, %11, %cst [0] : vector<8x20xf32> to vector<20xf32>
    %16 = vector.shape_cast %15 : vector<20xf32> to vector<1x20xf32>
    %cst_8 = arith.constant 8.000000e+00 : f32
    %17 = vector.broadcast %cst_8 : f32 to vector<1x20xf32>
    %18 = arith.divf %16, %17 : vector<1x20xf32>
    %19 = vector.broadcast %18 : vector<1x20xf32> to vector<8x20xf32>
    %20 = arith.subf %11, %19 : vector<8x20xf32>
    %21 = arith.mulf %20, %20 : vector<8x20xf32>
    %cst_9 = arith.constant dense<0.000000e+00> : vector<20xf32>
    %22 = vector.multi_reduction <add>, %21, %cst_9 [0] : vector<8x20xf32> to vector<20xf32>
    %23 = vector.shape_cast %22 : vector<20xf32> to vector<1x20xf32>
    %cst_10 = arith.constant 8.000000e+00 : f32
    %24 = vector.broadcast %cst_10 : f32 to vector<1x20xf32>
    %25 = arith.divf %23, %24 : vector<1x20xf32>
    %cst_11 = arith.constant 9.99999974E-6 : f32
    %26 = vector.broadcast %cst_11 : f32 to vector<1x20xf32>
    %27 = arith.addf %25, %26 : vector<1x20xf32>
    %28 = math.rsqrt %27 : vector<1x20xf32>
    %29 = arith.mulf %12, %28 : vector<1x20xf32>
    %cst_12 = arith.constant 1.250000e+00 : f32
    %30 = vector.broadcast %cst_12 : f32 to vector<1x20xf32>
    %31 = arith.mulf %29, %30 : vector<1x20xf32>
    %cst_13 = arith.constant 1.250000e+00 : f32
    %32 = vector.broadcast %cst_13 : f32 to vector<1x20xf32>
    %33 = arith.mulf %13, %32 : vector<1x20xf32>
    %34 = vector.broadcast %31 : vector<1x20xf32> to vector<8x20xf32>
    %35 = arith.mulf %20, %34 : vector<8x20xf32>
    %36 = vector.broadcast %33 : vector<1x20xf32> to vector<8x20xf32>
    %37 = arith.addf %35, %36 : vector<8x20xf32>
    %cst_14 = arith.constant 0.000000e+00 : f32
    %38 = vector.broadcast %cst_14 : f32 to vector<8x20xf32>
    %39 = arith.maximumf %37, %38 : vector<8x20xf32>
    %cst_15 = arith.constant 2.000000e-01 : f32
    %40 = vector.broadcast %cst_15 : f32 to vector<8x20xf32>
    %41 = arith.cmpf oge, %14, %40 : vector<8x20xf32>
    %cst_16 = arith.constant 0.000000e+00 : f32
    %42 = vector.broadcast %cst_16 : f32 to vector<8x20xf32>
    %43 = arith.select %41, %39, %42 : vector<8x20xi1>, vector<8x20xf32>
    %c16 = arith.constant 16 : index
    %c0_17 = arith.constant 0 : index
    %44 = vector.load %arg1[%c16, %c0_17] : memref<64x20xf32, #tpu.memory_space<vmem>>, vector<20x20xf32>
    %cst_18 = arith.constant dense<0.000000e+00> : vector<8x20xf32>
    %45 = tpu.matmul %43, %44, %cst_18 {dimension_numbers = #tpu.dot_dimension_numbers<[1], [0], [0], [1], [0, 0, 1, 1], [], []>} : vector<8x20xf32>, vector<20x20xf32>, vector<8x20xf32> -> vector<8x20xf32>
    %c40 = arith.constant 40 : index
    %c0_19 = arith.constant 0 : index
    %46 = vector.load %arg1[%c40, %c0_19] : memref<64x20xf32, #tpu.memory_space<vmem>>, vector<1x20xf32>
    %c41 = arith.constant 41 : index
    %c0_20 = arith.constant 0 : index
    %47 = vector.load %arg1[%c41, %c0_20] : memref<64x20xf32, #tpu.memory_space<vmem>>, vector<1x20xf32>
    %c8_21 = arith.constant 8 : index
    %c0_22 = arith.constant 0 : index
    %48 = vector.load %arg2[%c8_21, %c0_22] : memref<16x20xf32, #tpu.memory_space<vmem>>, vector<8x20xf32>
    %cst_23 = arith.constant dense<0.000000e+00> : vector<20xf32>
    %49 = vector.multi_reduction <add>, %45, %cst_23 [0] : vector<8x20xf32> to vector<20xf32>
    %50 = vector.shape_cast %49 : vector<20xf32> to vector<1x20xf32>
    %cst_24 = arith.constant 8.000000e+00 : f32
    %51 = vector.broadcast %cst_24 : f32 to vector<1x20xf32>
    %52 = arith.divf %50, %51 : vector<1x20xf32>
    %53 = vector.broadcast %52 : vector<1x20xf32> to vector<8x20xf32>
    %54 = arith.subf %45, %53 : vector<8x20xf32>
    %55 = arith.mulf %54, %54 : vector<8x20xf32>
    %cst_25 = arith.constant dense<0.000000e+00> : vector<20xf32>
    %56 = vector.multi_reduction <add>, %55, %cst_25 [0] : vector<8x20xf32> to vector<20xf32>
    %57 = vector.shape_cast %56 : vector<20xf32> to vector<1x20xf32>
    %cst_26 = arith.constant 8.000000e+00 : f32
    %58 = vector.broadcast %cst_26 : f32 to vector<1x20xf32>
    %59 = arith.divf %57, %58 : vector<1x20xf32>
    %cst_27 = arith.constant 9.99999974E-6 : f32
    %60 = vector.broadcast %cst_27 : f32 to vector<1x20xf32>
    %61 = arith.addf %59, %60 : vector<1x20xf32>
    %62 = math.rsqrt %61 : vector<1x20xf32>
    %63 = arith.mulf %46, %62 : vector<1x20xf32>
    %cst_28 = arith.constant 1.250000e+00 : f32
    %64 = vector.broadcast %cst_28 : f32 to vector<1x20xf32>
    %65 = arith.mulf %63, %64 : vector<1x20xf32>
    %cst_29 = arith.constant 1.250000e+00 : f32
    %66 = vector.broadcast %cst_29 : f32 to vector<1x20xf32>
    %67 = arith.mulf %47, %66 : vector<1x20xf32>
    %68 = vector.broadcast %65 : vector<1x20xf32> to vector<8x20xf32>
    %69 = arith.mulf %54, %68 : vector<8x20xf32>
    %70 = vector.broadcast %67 : vector<1x20xf32> to vector<8x20xf32>
    %71 = arith.addf %69, %70 : vector<8x20xf32>
    %cst_30 = arith.constant 0.000000e+00 : f32
    %72 = vector.broadcast %cst_30 : f32 to vector<8x20xf32>
    %73 = arith.maximumf %71, %72 : vector<8x20xf32>
    %cst_31 = arith.constant 2.000000e-01 : f32
    %74 = vector.broadcast %cst_31 : f32 to vector<8x20xf32>
    %75 = arith.cmpf oge, %48, %74 : vector<8x20xf32>
    %cst_32 = arith.constant 0.000000e+00 : f32
    %76 = vector.broadcast %cst_32 : f32 to vector<8x20xf32>
    %77 = arith.select %75, %73, %76 : vector<8x20xi1>, vector<8x20xf32>
    %c56 = arith.constant 56 : index
    %c0_33 = arith.constant 0 : index
    %78 = vector.load %arg1[%c56, %c0_33] : memref<64x20xf32, #tpu.memory_space<vmem>>, vector<1x2xf32>
    %c48 = arith.constant 48 : index
    %c0_34 = arith.constant 0 : index
    %79 = vector.load %arg1[%c48, %c0_34] : memref<64x20xf32, #tpu.memory_space<vmem>>, vector<1x20xf32>
    %80 = vector.broadcast %79 : vector<1x20xf32> to vector<8x20xf32>
    %81 = arith.mulf %77, %80 : vector<8x20xf32>
    %cst_35 = arith.constant dense<0.000000e+00> : vector<8xf32>
    %82 = vector.multi_reduction <add>, %81, %cst_35 [1] : vector<8x20xf32> to vector<8xf32>
    %83 = vector.shape_cast %82 : vector<8xf32> to vector<8x1xf32>
    %84 = vector.extract_strided_slice %78 {offsets = [0, 0], sizes = [1, 1], strides = [1, 1]} : vector<1x2xf32> to vector<1x1xf32>
    %85 = vector.broadcast %84 : vector<1x1xf32> to vector<8x1xf32>
    %86 = arith.addf %83, %85 : vector<8x1xf32>
    %c0_36 = arith.constant 0 : index
    %c0_37 = arith.constant 0 : index
    %87 = vector.load %arg3[%c0_36, %c0_37] : memref<8x2xf32, #tpu.memory_space<vmem>>, vector<8x1xf32>
    tpu.vector_store %arg3[%c0_36, %c0_37], %86 {strides = array<i32>} : memref<8x2xf32, #tpu.memory_space<vmem>>, vector<8x1xf32>,
    %c49 = arith.constant 49 : index
    %c0_38 = arith.constant 0 : index
    %88 = vector.load %arg1[%c49, %c0_38] : memref<64x20xf32, #tpu.memory_space<vmem>>, vector<1x20xf32>
    %89 = vector.broadcast %88 : vector<1x20xf32> to vector<8x20xf32>
    %90 = arith.mulf %77, %89 : vector<8x20xf32>
    %cst_39 = arith.constant dense<0.000000e+00> : vector<8xf32>
    %91 = vector.multi_reduction <add>, %90, %cst_39 [1] : vector<8x20xf32> to vector<8xf32>
    %92 = vector.shape_cast %91 : vector<8xf32> to vector<8x1xf32>
    %93 = vector.extract_strided_slice %78 {offsets = [0, 1], sizes = [1, 1], strides = [1, 1]} : vector<1x2xf32> to vector<1x1xf32>
    %94 = vector.broadcast %93 : vector<1x1xf32> to vector<8x1xf32>
    %95 = arith.addf %92, %94 : vector<8x1xf32>
    %c0_40 = arith.constant 0 : index
    %c1_41 = arith.constant 1 : index
    %96 = vector.load %arg3[%c0_40, %c1_41] : memref<8x2xf32, #tpu.memory_space<vmem>>, vector<8x1xf32>
    tpu.vector_store %arg3[%c0_40, %c1_41], %95 {strides = array<i32>} : memref<8x2xf32, #tpu.memory_space<vmem>>, vector<8x1xf32>,
    return
  }
}

</mosaic_0001>

<bundles_post_ra>
// kernel: perception_forward.1
= control target key start
LH: loop header
LB: loop body
LE: loop exit
PB: predicated region body
PF: predicated region fallthrough
CT: control target
= control target key end

     0   :  { %v260_v0 = vmov 0   ;;  %v261_v2 = vmov 1   ;;  %vm84_vm0 = vcmask 1043456   ;;  %v262_v4 = vmov 0.0   ;;  %s342_s0 = inlined_call_operand.vmem [shape: f32[8,2], index: 0, kind: input, shape index: {}]   ;;  %s343_s1 = inlined_call_operand.vmem [shape: f32[64,20], index: 1, kind: input, shape index: {}]   ;;  %s344_s2 = inlined_call_operand.vmem [shape: f32[16,20], index: 2, kind: input, shape index: {}]   ;;  %s345_s3 = inlined_call_operand.vmem [shape: f32[8,2], index: 3, kind: output, shape index: {}]  }
   0x1   :  { %254 = vset.pattern.permute.xlu0 %v260_v0  ;;  %v14_v1 = vld [vmem:[%s342_s0] sm:$0xff]  ;;  %241 = vmatprep.subr.mxu0 %v262_v4  ;;  %v79_v5 = vld [vmem:[%s343_s1 + $0x18] sm:$0xff]  ;;  %vm263_vm1 = vmmov 0   ;;  %v78_v6 = vld [vmem:[%s343_s1 + $0x10] sm:$0xff]  ;;  %vm40_vm2 = vcmask 162816   ;;  %v65_v33 = vlaneseq  ;;  %vm212_vm5 = vcmask 7168  }
   0x2   :  { %18 = vperm.xlu0 %254, %v14_v1   ;;  %v80_v3 = vld [vmem:[%s343_s1 + $0x20] sm:$0xf]  ;;  %247 = vmatprep.mubr.msk.f32.mxu0 %vm263_vm1, %v262_v4  ;;  %v37_v35 = vld [vmem:[%s343_s1 + $0x8] sm:$0x1]  ;;  %v38_v36 = vld [vmem:[%s343_s1 + $0x9] sm:$0x1] }
   0x3   :  { %242 = vmatpush3.msk.msra.mxu0 %vm84_vm0, %v80_v3  ;;  %v230_v8 = vld [vmem:[%s343_s1] ss:$0 sm:$0xff]  ;;  %v231_v9 = vld [vmem:[%s343_s1 + $0x1] ss:$0 sm:$0xff]  ;;  %v66_v34 = vshrl.u32 %v65_v33, 7  ;;  %v64_v40 = vmul.f32 1.25, %v38_v36 }
   0x4   :  { %243 = vmatprep.subr.mxu0 %v262_v4  ;;  %v39_v45 = vld [vmem:[%s344_s2] sm:$0xff]  ;;  %vm224_vm6 = vcmask 15368  }
   0x5   :  { %244 = vmatpush3.msra.mxu0 %v79_v5  ;;  %v67_v38 = vsub.s32 0, %v66_v34  ;;  %vm76_vm3 = vcmp.ge.f32.partialorder %v39_v45, 0.2 }
   0x6   :  { %255 = vset.pattern.permute.xlu0 %v261_v2  ;;  %245 = vmatprep.subr.mxu0 %v262_v4 }
   0x7   :  { %28 = vperm.xlu0 %255, %v14_v1   ;;  %246 = vmatpush3.msra.mxu0 %v78_v6  ;;  %v73_v43 = vrot.slane %v64_v40, %v67_v38  ;;  %v158_v6 = vld [vmem:[%s343_s1 + $0x28] sm:$0x1] }
  0x7d   :  { %v19_v7 = vpop.permute.xlu0 %18 }
  0x7e   :  { %v25_v11 = vmul.f32 %v230_v8, %v19_v7  ;;  %v159_v7 = vld [vmem:[%s343_s1 + $0x29] sm:$0x1] }
  0x82   :  { %v29_v10 = vpop.permute.xlu0 %28 }
  0x83   :  { %v35_v12 = vmul.f32 %v231_v9, %v29_v10  ;;  %v183_v10 = vmul.f32 1.25, %v159_v7 }
  0x85   :  { %v36_v13 = vadd.f32 %v35_v12, %v25_v11 }
  0x87   :  { %v41_v14 = vsel %vm40_vm2, %v36_v13, 0.0 }
  0x88   :  { %v42_v15 = vrot.slane %v41_v14, 4 }
  0x8a   :  { %v43_v16 = vadd.f32 %v42_v15, %v41_v14  ;;  %v160_v15 = vld [vmem:[%s344_s2 + $0x8] sm:$0xff] }
  0x8b   :  { %vm195_vm4 = vcmp.ge.f32.partialorder %v160_v15, 0.2 }
  0x8c   :  { %v44_v17 = vrot.slane %v43_v16, 2 }
  0x8e   :  { %v45_v18 = vadd.f32 %v44_v17, %v43_v16 }
  0x90   :  { %v46_v19 = vrot.slane %v45_v18, 1 }
  0x92   :  { %v47_v20 = vadd.f32 %v46_v19, %v45_v18  ;;  %v234_v18 = vld [vmem:[%s343_s1 + $0x30] ss:$0 sm:$0xff] }
  0x94   :  { %v49_v21 = vmul.f32 0.125, %v47_v20  ;;  %v236_v20 = vld [vmem:[%s343_s1 + $0x31] ss:$0 sm:$0xff] }
  0x96   :  { %v50_v22 = vsub.f32 %v36_v13, %v49_v21  ;;  %v192_v13 = vrot.slane %v183_v10, %v67_v38 }
  0x98   :  { %v51_v23 = vmul.f32 %v50_v22, %v50_v22 }
  0x9a   :  { %v52_v24 = vsel %vm40_vm2, %v51_v23, 0.0 }
  0x9b   :  { %v53_v25 = vrot.slane %v52_v24, 4 }
  0x9d   :  { %v54_v26 = vadd.f32 %v53_v25, %v52_v24  ;;  %v235_v25 = vld [vmem:[%s343_s1 + $0x38] ss:$0 sm:$0xff] }
  0x9f   :  { %v55_v27 = vrot.slane %v54_v26, 2 }
  0xa1   :  { %v56_v28 = vadd.f32 %v55_v27, %v54_v26 }
  0xa3   :  { %v57_v29 = vrot.slane %v56_v28, 1 }
  0xa5   :  { %v58_v30 = vadd.f32 %v57_v29, %v56_v28 }
  0xa7   :  { %v59_v31 = vmul.f32 0.125, %v58_v30 }
  0xa9   :  { %v60_v32 = vadd.f32 1e-05, %v59_v31 }
  0xab   :  { %256 = vrsqrt.f32 %v60_v32 }
  0xb8   :  { %v257_v37 = vpop.eup %256 }
  0xb9   :  { %v62_v39 = vmul.f32 %v257_v37, %v37_v35 }
  0xbb   :  { %v63_v41 = vmul.f32 1.25, %v62_v39 }
  0xbd   :  { %v68_v42 = vrot.slane %v63_v41, %v67_v38 }
  0xbf   :  { %v69_v44 = vmul.f32 %v68_v42, %v50_v22 }
  0xc1   :  { %v74_v46 = vadd.f32 %v73_v43, %v69_v44 }
  0xc3   :  { %v75_v47 = vmax.f32 %v74_v46, 0.0 }
  0xc5   :  { %v77_v48 = vsel %vm76_vm3, %v75_v47, 0.0 }
  0xc6   :  { %248 = vmatmul.mubr.msk.f32.vlgmr.msra.gmra.mxu0 %vm40_vm2, %v77_v48 }
 0x186   :  { %v154_v49 = vpop.f32.mrf.mxu0 }
 0x187   :  { %v161_v50 = vsel %vm40_vm2, %v154_v49, 0.0 }
 0x188   :  { %v162_v51 = vrot.slane %v161_v50, 4  ;;  %v249_v52 = vpop.f32.mrf.mxu0 }
 0x18a   :  { %v163_v53 = vadd.f32 %v162_v51, %v161_v50 }
 0x18c   :  { %v164_v54 = vrot.slane %v163_v53, 2 }
 0x18e   :  { %v165_v55 = vadd.f32 %v164_v54, %v163_v53 }
 0x190   :  { %v166_v56 = vrot.slane %v165_v55, 1 }
 0x192   :  { %v167_v57 = vadd.f32 %v166_v56, %v165_v55 }
 0x194   :  { %v168_v58 = vmul.f32 0.125, %v167_v57 }
 0x196   :  { %v169_v59 = vsub.f32 %v154_v49, %v168_v58 }
 0x198   :  { %v170_v60 = vmul.f32 %v169_v59, %v169_v59 }
 0x19a   :  { %v171_v61 = vsel %vm40_vm2, %v170_v60, 0.0 }
 0x19b   :  { %v172_v62 = vrot.slane %v171_v61, 4 }
 0x19d   :  { %v173_v63 = vadd.f32 %v172_v62, %v171_v61 }
 0x19f   :  { %v174_v0 = vrot.slane %v173_v63, 2 }
 0x1a1   :  { %v175_v1 = vadd.f32 %v174_v0, %v173_v63 }
 0x1a3   :  { %v176_v2 = vrot.slane %v175_v1, 1 }
 0x1a5   :  { %v177_v3 = vadd.f32 %v176_v2, %v175_v1 }
 0x1a7   :  { %v178_v4 = vmul.f32 0.125, %v177_v3 }
 0x1a9   :  { %v179_v5 = vadd.f32 1e-05, %v178_v4 }
 0x1ab   :  { %258 = vrsqrt.f32 %v179_v5 }
 0x1b8   :  { %v259_v8 = vpop.eup %258 }
 0x1b9   :  { %v181_v9 = vmul.f32 %v259_v8, %v158_v6 }
 0x1bb   :  { %v182_v11 = vmul.f32 1.25, %v181_v9 }
 0x1bd   :  { %v187_v12 = vrot.slane %v182_v11, %v67_v38 }
 0x1bf   :  { %v188_v14 = vmul.f32 %v187_v12, %v169_v59 }
 0x1c1   :  { %v193_v16 = vadd.f32 %v192_v13, %v188_v14 }
 0x1c3   :  { %v194_v17 = vmax.f32 %v193_v16, 0.0 }
 0x1c5   :  { %v196_v19 = vsel %vm195_vm4, %v194_v17, 0.0 }
 0x1c6   :  { %v203_v21 = vmul.f32 %v234_v18, %v196_v19  ;;  %v219_v23 = vmul.f32 %v236_v20, %v196_v19 }
 0x1c8   :  { %v204_v22 = vsel %vm40_vm2, %v203_v21, 0.0  ;;  %v220_v24 = vsel %vm40_vm2, %v219_v23, 0.0 }
 0x1c9   :  { %205 = vadd.xlane.f32.xlu1 %v204_v22 }
 0x1cd   :  { %221 = vadd.xlane.f32.xlu1 %v220_v24 }
 0x252   :  { %v206_v26 = vpop.xlane.xlu1 %205 }
 0x253   :  { %v211_v27 = vadd.f32 %v235_v25, %v206_v26 }
 0x255   :  { %213 = vst.msk [vmem:[%s345_s3] sm:$0xff] %vm212_vm5, %v211_v27 }
 0x256   :  { %v222_v28 = vpop.xlane.xlu1 %221 }
 0x257   :  { %v223_v29 = vadd.f32 %v235_v25, %v222_v28 }
 0x259   :  { %225 = vst.msk [vmem:[%s345_s3] sm:$0xff] %vm224_vm6, %v223_v29 }

</bundles_post_ra>
